<compile_context>
chip_gen: v6e
topology: v6e:2x2x1
jax: 0.10.0
libtpu: 0.0.40
codegen_flags: <defaults>
</compile_context>

<pallas_src>
import functools

import jax
import jax.numpy as jnp
import numpy as np
from jax.experimental import pallas as pl
from jax.experimental.pallas import tpu as pltpu


def _legendre_kan_kernel(xt_ref, wt_ref, bias_ref, ot_ref, *,
                         degree: int, matmul_dtype):
    """One batch tile (transposed layout).

    xt_ref:   (I, TB)            input tile, batch on lanes
    wt_ref:   (O, degree*I)      fused coefficients for degrees 1..degree
    bias_ref: (O, 1)             sum_i coeffs[i, :, 0]  (the P_0 == 1 term)
    ot_ref:   (O, TB)            output tile (y^T)
    """
    # tanh + recurrence stay in f32 (v5e has no bf16 VPU/EUP; accuracy).
    x = jnp.tanh(xt_ref[...].astype(jnp.float32))            # (I, TB)

    # Legendre recurrence, unrolled at trace time (degree is static).
    polys = [x]                                               # P_1 (P_0 folded into bias)
    p_prev, p_curr = jnp.ones_like(x), x
    for i in range(2, degree + 1):
        p_next = ((2.0 * i - 1.0) / i) * x * p_curr - ((i - 1.0) / i) * p_prev
        polys.append(p_next)
        p_prev, p_curr = p_curr, p_next

    # Stack the basis along the contraction (sublane) axis: (degree*I, TB).
    basis = jnp.concatenate(polys, axis=0).astype(matmul_dtype)

    # Single fused matmul on the MXU, f32 accumulator.
    acc = jnp.dot(wt_ref[...], basis,
                  preferred_element_type=jnp.float32)          # (O, TB)

    ot_ref[...] = (acc + bias_ref[...]).astype(ot_ref.dtype)


def legendre_kan_forward(x, coeffs, *, degree: int, batch_tile: int = 1024,
                         matmul_dtype=jnp.float32):
    """x: any shape whose trailing dim is input_dim (leading dims flattened).
    coeffs: (input_dim, output_dim, degree+1) — PyTorch parameter layout.
    Returns: (N, output_dim) float32."""
    input_dim, output_dim, d_plus_1 = coeffs.shape
    assert d_plus_1 == degree + 1
    assert batch_tile % 128 == 0, "batch_tile must be a multiple of 128 (lane width)"

    x2 = x.reshape(-1, input_dim)
    n = x2.shape[0]

    coeffs = coeffs.astype(jnp.float32)
    # P_0 == 1 contribution -> bias[o] = sum_i coeffs[i, o, 0], shape (O, 1).
    bias = jnp.sum(coeffs[:, :, 0], axis=0).reshape(output_dim, 1)

    if degree == 0:
        # Degenerate case: output is just the bias, no matmul needed.
        return jnp.broadcast_to(bias[:, 0][None, :], (n, output_dim)).astype(jnp.float32)

    # (I, O, D) for degrees 1..D  ->  (O, D*I), column k = (d-1)*I + i holds coeffs[i, o, d].
    w_t = jnp.transpose(coeffs[:, :, 1:], (1, 2, 0)).reshape(output_dim,
                                                             degree * input_dim)
    w_t = w_t.astype(matmul_dtype)

    # Pad the batch to a multiple of batch_tile (ragged N) and transpose so the
    # batch dimension sits on the lane axis.  Both are wrapper-side plumbing.
    n_pad = pl.cdiv(n, batch_tile) * batch_tile
    x_t = jnp.pad(x2.astype(jnp.float32), ((0, n_pad - n), (0, 0))).T   # (I, n_pad)

    kernel = functools.partial(_legendre_kan_kernel, degree=degree,
                               matmul_dtype=matmul_dtype)

    cost = pl.CostEstimate(
        flops=2 * n_pad * degree * input_dim * output_dim          # fused matmul
              + 4 * n_pad * input_dim * (degree - 1)               # recurrence
              + 2 * n_pad * output_dim,                            # bias add
        transcendentals=n_pad * input_dim,                         # tanh
        bytes_accessed=(x_t.size * 4 + w_t.size * jnp.dtype(matmul_dtype).itemsize
                        + bias.size * 4 + n_pad * output_dim * 4),
    )

    y_t = pl.pallas_call(
        kernel,
        out_shape=jax.ShapeDtypeStruct((output_dim, n_pad), jnp.float32),
        grid_spec=pltpu.PrefetchScalarGridSpec(
            num_scalar_prefetch=0,
            grid=(n_pad // batch_tile,),
            in_specs=[
                pl.BlockSpec((input_dim, batch_tile), lambda i: (0, i)),
                pl.BlockSpec((output_dim, degree * input_dim), lambda i: (0, 0)),
                pl.BlockSpec((output_dim, 1), lambda i: (0, 0)),
            ],
            out_specs=pl.BlockSpec((output_dim, batch_tile), lambda i: (0, i)),
        ),
        compiler_params=pltpu.CompilerParams(
            dimension_semantics=("parallel",)),   # lets v7x shard tiles across its 2 TCs
        cost_estimate=cost,
    )(x_t, w_t, bias)

    # Transpose back to (N, O) and drop the padded rows.
    return y_t.T[:n]


def _reference(x, coeffs, degree):
    """Pure-JAX reference mirroring the PyTorch LegendreKANLayer forward."""
    input_dim = coeffs.shape[0]
    x2 = jnp.tanh(x.reshape(-1, input_dim)).astype(jnp.float32)
    polys = [jnp.ones_like(x2)]
    if degree >= 1:
        polys.append(x2)
    for i in range(2, degree + 1):
        polys.append(((2 * i - 1) / i) * x2 * polys[i - 1]
                     - ((i - 1) / i) * polys[i - 2])
    leg = jnp.stack(polys, axis=-1)                                # (N, I, D+1)
    return jnp.einsum('bid,iod->bo', leg, coeffs.astype(jnp.float32))


if __name__ == "__main__":
    input_dim = 16
    output_dim = 32
    degree = 5

    key = jax.random.PRNGKey(0)
    kx, kw = jax.random.split(key)

    # Input: leading dims flatten to N = 32, trailing dim = input_dim.
    x = jax.random.normal(kx, (2, 16, input_dim), dtype=jnp.float32)

    # Deterministic init matching nn.init.normal_(mean=0, std=1/(input_dim*(degree+1))).
    std = 1.0 / (input_dim * (degree + 1))
    coeffs = std * jax.random.normal(
        kw, (input_dim, output_dim, degree + 1), dtype=jnp.float32)

    # Default large batch_tile; ragged N (32) is handled by wrapper-side padding.
    y = legendre_kan_forward(x, coeffs, degree=degree)
    y = jax.block_until_ready(y)

    y_ref = _reference(x, coeffs, degree)
    np.testing.assert_allclose(np.asarray(y), np.asarray(y_ref),
                               rtol=1e-5, atol=1e-5)

    print("KERNEL_OK")
</pallas_src>

<mosaic_0001>
module attributes {stable_mosaic.version = 11 : i64} {
  func.func @_legendre_kan_kernel(%arg0: i32, %arg1: memref<16x1024xf32, #tpu.memory_space<vmem>>, %arg2: memref<32x80xf32, #tpu.memory_space<vmem>>, %arg3: memref<32x1xf32, #tpu.memory_space<vmem>>, %arg4: memref<32x1024xf32, #tpu.memory_space<vmem>>) attributes {dimension_semantics = [#tpu.dimension_semantics<parallel>], iteration_bounds = array<i64: 1>, scalar_prefetch = 0 : i64, scratch_operands = 0 : i64, tpu.core_type = #tpu.core_type<tc>, window_params = [{transform_indices = @transform_0, window_bounds = array<i64: 16, 1024>}, {pipeline_mode = #tpu.pipeline_mode<synchronous>, transform_indices = @transform_1, window_bounds = array<i64: 32, 80>}, {pipeline_mode = #tpu.pipeline_mode<synchronous>, transform_indices = @transform_2, window_bounds = array<i64: 32, 1>}, {transform_indices = @transform_3, window_bounds = array<i64: 32, 1024>}]} {
    %c0 = arith.constant 0 : index
    %c0_0 = arith.constant 0 : index
    %0 = vector.load %arg1[%c0, %c0_0] : memref<16x1024xf32, #tpu.memory_space<vmem>>, vector<16x1024xf32>
    %1 = math.tanh %0 : vector<16x1024xf32>
    %cst = arith.constant 1.000000e+00 : f32
    %2 = vector.broadcast %cst : f32 to vector<16x1024xf32>
    %cst_1 = arith.constant 1.500000e+00 : f32
    %3 = vector.broadcast %cst_1 : f32 to vector<16x1024xf32>
    %4 = arith.mulf %3, %1 : vector<16x1024xf32>
    %5 = arith.mulf %4, %1 : vector<16x1024xf32>
    %cst_2 = arith.constant 5.000000e-01 : f32
    %6 = vector.broadcast %cst_2 : f32 to vector<16x1024xf32>
    %7 = arith.mulf %6, %2 : vector<16x1024xf32>
    %8 = arith.subf %5, %7 : vector<16x1024xf32>
    %cst_3 = arith.constant 1.66666663 : f32
    %9 = vector.broadcast %cst_3 : f32 to vector<16x1024xf32>
    %10 = arith.mulf %9, %1 : vector<16x1024xf32>
    %11 = arith.mulf %10, %8 : vector<16x1024xf32>
    %cst_4 = arith.constant 0.666666686 : f32
    %12 = vector.broadcast %cst_4 : f32 to vector<16x1024xf32>
    %13 = arith.mulf %12, %1 : vector<16x1024xf32>
    %14 = arith.subf %11, %13 : vector<16x1024xf32>
    %cst_5 = arith.constant 1.750000e+00 : f32
    %15 = vector.broadcast %cst_5 : f32 to vector<16x1024xf32>
    %16 = arith.mulf %15, %1 : vector<16x1024xf32>
    %17 = arith.mulf %16, %14 : vector<16x1024xf32>
    %cst_6 = arith.constant 7.500000e-01 : f32
    %18 = vector.broadcast %cst_6 : f32 to vector<16x1024xf32>
    %19 = arith.mulf %18, %8 : vector<16x1024xf32>
    %20 = arith.subf %17, %19 : vector<16x1024xf32>
    %cst_7 = arith.constant 1.800000e+00 : f32
    %21 = vector.broadcast %cst_7 : f32 to vector<16x1024xf32>
    %22 = arith.mulf %21, %1 : vector<16x1024xf32>
    %23 = arith.mulf %22, %20 : vector<16x1024xf32>
    %cst_8 = arith.constant 8.000000e-01 : f32
    %24 = vector.broadcast %cst_8 : f32 to vector<16x1024xf32>
    %25 = arith.mulf %24, %14 : vector<16x1024xf32>
    %26 = arith.subf %23, %25 : vector<16x1024xf32>
    %27 = tpu.concatenate %1, %8, %14, %20, %26 in 0 : vector<16x1024xf32>, vector<16x1024xf32>, vector<16x1024xf32>, vector<16x1024xf32>, vector<16x1024xf32> -> vector<80x1024xf32>
    %c0_9 = arith.constant 0 : index
    %c0_10 = arith.constant 0 : index
    %28 = vector.load %arg2[%c0_9, %c0_10] : memref<32x80xf32, #tpu.memory_space<vmem>>, vector<32x80xf32>
    %cst_11 = arith.constant dense<0.000000e+00> : vector<32x1024xf32>
    %29 = tpu.matmul %28, %27, %cst_11 {dimension_numbers = #tpu.dot_dimension_numbers<[1], [0], [0], [1], [0, 0, 1, 1], [], []>} : vector<32x80xf32>, vector<80x1024xf32>, vector<32x1024xf32> -> vector<32x1024xf32>
    %c0_12 = arith.constant 0 : index
    %c0_13 = arith.constant 0 : index
    %30 = vector.load %arg3[%c0_12, %c0_13] : memref<32x1xf32, #tpu.memory_space<vmem>>, vector<32x1xf32>
    %31 = vector.broadcast %30 : vector<32x1xf32> to vector<32x1024xf32>
    %32 = arith.addf %29, %31 : vector<32x1024xf32>
    %c0_14 = arith.constant 0 : index
    %c0_15 = arith.constant 0 : index
    %33 = vector.load %arg4[%c0_14, %c0_15] : memref<32x1024xf32, #tpu.memory_space<vmem>>, vector<32x1024xf32>
    tpu.vector_store %arg4[%c0_14, %c0_15], %32 {strides = array<i32>} : memref<32x1024xf32, #tpu.memory_space<vmem>>, vector<32x1024xf32>,
    return
  }
  func.func @transform_0(%arg0: i32) -> (i32, i32) {
    %c0_i32 = arith.constant 0 : i32
    %c0_i32_0 = arith.constant 0 : i32
    return %c0_i32, %arg0 : i32, i32
  }
  func.func @transform_1(%arg0: i32) -> (i32, i32) {
    %c0_i32 = arith.constant 0 : i32
    %c0_i32_0 = arith.constant 0 : i32
    %c0_i32_1 = arith.constant 0 : i32
    return %c0_i32, %c0_i32_0 : i32, i32
  }
  func.func @transform_2(%arg0: i32) -> (i32, i32) {
    %c0_i32 = arith.constant 0 : i32
    %c0_i32_0 = arith.constant 0 : i32
    %c0_i32_1 = arith.constant 0 : i32
    return %c0_i32, %c0_i32_0 : i32, i32
  }
  func.func @transform_3(%arg0: i32) -> (i32, i32) {
    %c0_i32 = arith.constant 0 : i32
    %c0_i32_0 = arith.constant 0 : i32
    return %c0_i32, %arg0 : i32, i32
  }
}

</mosaic_0001>

<bundles_post_ra>
// kernel: tpu_custom_call.1
= control target key start
LH: loop header
LB: loop body
LE: loop exit
PB: predicated region body
PF: predicated region fallthrough
CT: control target
= control target key end

     0   :  { %8 = vsyncpa [#allocation3], 0  ;;  %s1349_s0 = inlined_call_operand.hbm [shape: f32[16,1024], index: 0, kind: input, shape index: {}]   ;;  %s1350_s1 = inlined_call_operand.vmem [shape: f32[32,80], index: 1, kind: input, shape index: {}]   ;;  %s1351_s2 = inlined_call_operand.vmem [shape: f32[32,1], index: 2, kind: input, shape index: {}]   ;;  %s1352_s3 = inlined_call_operand.hbm [shape: f32[32,1024], index: 3, kind: output, shape index: {}]  }
   0x1   :  { %9 = vsyncpa [#allocation4], 0  ;;  %s863_s12 = smov [#allocation2]  }
   0x2   :  { %s15_s13 = sshll.u32 %s863_s12, 4  ;;  %s16_s13 = int_to_ptr.vmem [resolvable:$true] %s15_s13 }
   0x3   :  { %s827_s14 = scalar_lea.vmem %s16_s13, 2048  ;;  %p832_p1 = scmp.lt.s32.totalorder %s16_s13, %s16_s13 }
   0x4   :  { %p828_p0 = scmp.ne.s32.totalorder %s16_s13, %s827_s14  ;;  %p833_p2 = scmp.lt.s32.totalorder %s827_s14, %s827_s14 }
   0x6   :  { %p834_p3 = por %p833_p2, %p832_p1 }
   0x8   :  { %p835_p4 = pnand %p834_p3, %p828_p0 }
   0xa   :  { %838 = shalt.err (!%p835_p4)
}
   0xb   :  { %s864_s15 = smov 1024   ;;  %s865_s16 = smov 64  }
   0xc   :  { %21 = dma.hbm_to_vmem [thread:$0]  %s1349_s0, 2048, %s16_s13, [#allocation3], %s864_s15, %s864_s15, %s865_s16  }
   0xd   :  { %859 = dma.done.wait [#allocation3], 2048  }
   0xe   :  { %860 = vsyncadd [#allocation3], 4294965248  ;;  %v866_v0 = vmov 0.0   ;;  %v867_v1 = vmov 0   ;;  %v38_v2 = vld [vmem:[#allocation2 + $0x48] sm:$0xff]  ;;  %v40_v3 = vld [vmem:[#allocation2 + $0x58] sm:$0xff] }
   0xf   :  { %406 = vmatprep.mubr.f32.mxu0 %v866_v0  ;;  %495 = vmatprep.mubr.f32.mxu1 %v866_v0  ;;  %v37_v4 = vld [vmem:[#allocation2 + $0x40] sm:$0xff]  ;;  %787 = vtanh.f32 %v38_v2  ;;  %v39_v5 = vld [vmem:[#allocation2 + $0x50] sm:$0xff]  ;;  %v30_v6 = vld [vmem:[#allocation2 + $0x8] sm:$0xff]  ;;  %vm329_vm0 = vcmask 654336  }
  0x10   :  { %785 = vset.pattern.permute.xlu0 %v867_v1  ;;  %786 = vset.pattern.permute.xlu1 %v867_v1  ;;  %789 = vtanh.f32 %v40_v3  ;;  %v32_v7 = vld [vmem:[#allocation2 + $0x18] sm:$0xff]  ;;  %v305_v8 = vld [vmem:[%s1351_s2] sm:$0xff]  ;;  %v307_v10 = vld [vmem:[%s1351_s2 + $0x10] sm:$0xff] }
  0x11   :  { %791 = vtanh.f32 %v37_v4  ;;  %v29_v9 = vld [vmem:[#allocation2] sm:$0xff]  ;;  %311 = vperm.xlu0 %785, %v305_v8   ;;  %v31_v11 = vld [vmem:[#allocation2 + $0x10] sm:$0xff]  ;;  %v306_v12 = vld [vmem:[%s1351_s2 + $0x8] sm:$0xff]  ;;  %321 = vperm.xlu1 %786, %v307_v10  }
  0x12   :  { %793 = vtanh.f32 %v39_v5  ;;  %v42_v13 = vld [vmem:[#allocation2 + $0x68] sm:$0xff]  ;;  %v308_v14 = vld [vmem:[%s1351_s2 + $0x18] sm:$0xff]  ;;  %v41_v16 = vld [vmem:[#allocation2 + $0x60] sm:$0xff] }
  0x13   :  { %795 = vtanh.f32 %v30_v6  ;;  %v44_v15 = vld [vmem:[#allocation2 + $0x78] sm:$0xff]  ;;  %v43_v17 = vld [vmem:[#allocation2 + $0x70] sm:$0xff] }
  0x14   :  { %797 = vtanh.f32 %v32_v7 }
  0x15   :  { %799 = vtanh.f32 %v29_v9  ;;  %316 = vperm.xlu0 %785, %v306_v12   ;;  %326 = vperm.xlu1 %786, %v308_v14  }
  0x16   :  { %801 = vtanh.f32 %v31_v11 }
  0x17   :  { %803 = vtanh.f32 %v42_v13 }
  0x18   :  { %805 = vtanh.f32 %v44_v15 }
  0x19   :  { %807 = vtanh.f32 %v41_v16 }
  0x1a   :  { %809 = vtanh.f32 %v43_v17 }
  0x1c   :  { %v909_v18 = vpop.eup %787 }
  0x1d   :  { %v911_v19 = vpop.eup %789  ;;  %v70_v20 = vmul.f32 1.5, %v909_v18  ;;  %v118_v21 = vmul.f32 1.6666666, %v909_v18  ;;  %v150_v22 = vmul.f32 0.6666667, %v909_v18  ;;  %v182_v24 = vmul.f32 1.75, %v909_v18 }
  0x1e   :  { %v916_v23 = vpop.eup %791  ;;  %v246_v25 = vmul.f32 1.8, %v909_v18  ;;  %v72_v26 = vmul.f32 1.5, %v911_v19  ;;  %v120_v27 = vmul.f32 1.6666666, %v911_v19  ;;  %v184_v31 = vmul.f32 1.75, %v911_v19 }
  0x1f   :  { %v922_v28 = vpop.eup %793  ;;  %v86_v29 = vmul.f32 %v909_v18, %v70_v20  ;;  %v152_v30 = vmul.f32 0.6666667, %v911_v19  ;;  %v69_v32 = vmul.f32 1.5, %v916_v23  ;;  %v248_v34 = vmul.f32 1.8, %v911_v19 }
  0x20   :  { %v88_v33 = vmul.f32 %v911_v19, %v72_v26  ;;  %v117_v35 = vmul.f32 1.6666666, %v916_v23  ;;  %v149_v36 = vmul.f32 0.6666667, %v916_v23  ;;  %v932_v37 = vpop.eup %795  ;;  %v245_v40 = vmul.f32 1.8, %v916_v23 }
  0x21   :  { %v934_v38 = vadd.f32 -0.5, %v86_v29  ;;  %v85_v39 = vmul.f32 %v916_v23, %v69_v32  ;;  %v71_v41 = vmul.f32 1.5, %v922_v28  ;;  %v181_v43 = vmul.f32 1.75, %v916_v23  ;;  %v949_v50 = vpop.eup %797 }
  0x22   :  { %v939_v42 = vadd.f32 -0.5, %v88_v33  ;;  %v119_v44 = vmul.f32 1.6666666, %v922_v28  ;;  %v151_v45 = vmul.f32 0.6666667, %v922_v28  ;;  %v183_v49 = vmul.f32 1.75, %v922_v28  ;;  %v955_v55 = vpop.eup %799 }
  0x23   :  { %v134_v46 = vmul.f32 %v934_v38, %v118_v21  ;;  %v945_v47 = vadd.f32 -0.5, %v85_v39  ;;  %v87_v48 = vmul.f32 %v922_v28, %v71_v41  ;;  %v214_v51 = vmul.f32 0.75, %v934_v38  ;;  %v963_v60 = vpop.eup %801 }
  0x24   :  { %v136_v52 = vmul.f32 %v939_v42, %v120_v27  ;;  %v216_v53 = vmul.f32 0.75, %v939_v42  ;;  %v62_v54 = vmul.f32 1.5, %v932_v37  ;;  %v247_v59 = vmul.f32 1.8, %v922_v28  ;;  %v970_v2 = vpop.eup %803 }
  0x25   :  { %v957_v56 = vsub.f32 %v134_v46, %v150_v22  ;;  %v133_v57 = vmul.f32 %v945_v47, %v117_v35  ;;  %v960_v58 = vadd.f32 -0.5, %v87_v48  ;;  %v213_v62 = vmul.f32 0.75, %v945_v47  ;;  %v977_v7 = vpop.eup %805  ;;  %v36_v48 = vld [vmem:[#allocation2 + $0x38] sm:$0xff] }
  0x26   :  { %v965_v61 = vsub.f32 %v136_v52, %v152_v30  ;;  %v78_v63 = vmul.f32 %v932_v37, %v62_v54  ;;  %v110_v1 = vmul.f32 1.6666666, %v932_v37  ;;  %v142_v6 = vmul.f32 0.6666667, %v932_v37  ;;  %v984_v12 = vpop.eup %807 }
  0x27   :  { %v198_v3 = vmul.f32 %v182_v24, %v957_v56  ;;  %v973_v4 = vsub.f32 %v133_v57, %v149_v36  ;;  %v135_v5 = vmul.f32 %v960_v58, %v119_v44  ;;  %v278_v8 = vmul.f32 0.8, %v957_v56  ;;  %v992_v17 = vpop.eup %809  ;;  %v34_v36 = vld [vmem:[#allocation2 + $0x28] sm:$0xff] }
  0x28   :  { %v200_v9 = vmul.f32 %v184_v31, %v965_v61  ;;  %v280_v10 = vmul.f32 0.8, %v965_v61  ;;  %v982_v11 = vadd.f32 -0.5, %v78_v63  ;;  %v215_v16 = vmul.f32 0.75, %v960_v58 }
  0x29   :  { %v986_v13 = vsub.f32 %v198_v3, %v214_v51  ;;  %v197_v14 = vmul.f32 %v181_v43, %v973_v4  ;;  %v989_v15 = vsub.f32 %v135_v5, %v151_v45  ;;  %v277_v21 = vmul.f32 0.8, %v973_v4 }
  0x2a   :  { %v994_v20 = vsub.f32 %v200_v9, %v216_v53  ;;  %v126_v22 = vmul.f32 %v982_v11, %v110_v1  ;;  %v174_v24 = vmul.f32 1.75, %v932_v37  ;;  %v206_v30 = vmul.f32 0.75, %v982_v11 }
  0x2b   :  { %v262_v26 = vmul.f32 %v246_v25, %v986_v13  ;;  %v1000_v27 = vsub.f32 %v197_v14, %v213_v62  ;;  %v199_v29 = vmul.f32 %v183_v49, %v989_v15  ;;  %v279_v32 = vmul.f32 0.8, %v989_v15 }
  0x2c   :  { %v264_v31 = vmul.f32 %v248_v34, %v994_v20  ;;  %v1006_v33 = vsub.f32 %v126_v22, %v142_v6  ;;  %v64_v35 = vmul.f32 1.5, %v949_v50  ;;  %v238_v25 = vmul.f32 1.8, %v932_v37 }
  0x2d   :  { %v294_v39 = vsub.f32 %v262_v26, %v278_v8  ;;  %v261_v41 = vmul.f32 %v245_v40, %v1000_v27  ;;  %v1010_v43 = vsub.f32 %v199_v29, %v215_v16  ;;  %v112_v34 = vmul.f32 1.6666666, %v949_v50 }
  0x2e   :  { %v296_v44 = vsub.f32 %v264_v31, %v280_v10  ;;  %v190_v45 = vmul.f32 %v174_v24, %v1006_v33  ;;  %v80_v46 = vmul.f32 %v949_v50, %v64_v35  ;;  %v270_v52 = vmul.f32 0.8, %v1006_v33 }
  0x2f   :  { %354 = vmatprep.subr.mxu0 %v294_v39  ;;  %v293_v49 = vsub.f32 %v261_v41, %v277_v21  ;;  %v263_v51 = vmul.f32 %v247_v59, %v1010_v43  ;;  %811 = vtanh.f32 %v34_v36  ;;  %v144_v54 = vmul.f32 0.6666667, %v949_v50 }
  0x30   :  { %443 = vmatprep.subr.mxu1 %v296_v44  ;;  %v1018_v40 = vsub.f32 %v190_v45, %v206_v30  ;;  %v1020_v53 = vadd.f32 -0.5, %v80_v46  ;;  %v61_v57 = vmul.f32 1.5, %v955_v55  ;;  %v176_v63 = vmul.f32 1.75, %v949_v50 }
  0x31   :  { %355 = vmatpush1.msra.mxu0 %v293_v49  ;;  %v295_v62 = vsub.f32 %v263_v51, %v279_v32  ;;  %813 = vtanh.f32 %v36_v48  ;;  %v109_v5 = vmul.f32 1.6666666, %v955_v55  ;;  %v240_v6 = vmul.f32 1.8, %v949_v50 }
  0x32   :  { %v254_v1 = vmul.f32 %v238_v25, %v1018_v40  ;;  %v128_v59 = vmul.f32 %v1020_v53, %v112_v34  ;;  %v77_v3 = vmul.f32 %v955_v55, %v61_v57  ;;  %v141_v8 = vmul.f32 0.6666667, %v955_v55 }
  0x33   :  { %444 = vmatpush1.msra.mxu1 %v295_v62  ;;  %v173_v9 = vmul.f32 1.75, %v955_v55  ;;  %v63_v10 = vmul.f32 1.5, %v963_v60  ;;  %v208_v21 = vmul.f32 0.75, %v1020_v53  ;;  %v237_v24 = vmul.f32 1.8, %v955_v55 }
  0x34   :  { %v286_v14 = vsub.f32 %v254_v1, %v270_v52  ;;  %v1033_v16 = vsub.f32 %v128_v59, %v144_v54  ;;  %v1036_v22 = vadd.f32 -0.5, %v77_v3  ;;  %v111_v29 = vmul.f32 1.6666666, %v963_v60 }
  0x35   :  { %v79_v26 = vmul.f32 %v963_v60, %v63_v10  ;;  %v74_v30 = vmul.f32 1.5, %v970_v2  ;;  %v143_v35 = vmul.f32 0.6666667, %v963_v60  ;;  %v175_v36 = vmul.f32 1.75, %v963_v60 }
  0x36   :  { %356 = vmatprep.subr.mxu0 %v286_v14  ;;  %v192_v31 = vmul.f32 %v176_v63, %v1033_v16  ;;  %v125_v32 = vmul.f32 %v1036_v22, %v109_v5  ;;  %v272_v39 = vmul.f32 0.8, %v1033_v16  ;;  %v122_v44 = vmul.f32 1.6666666, %v970_v2 }
  0x37   :  { %v1047_v41 = vadd.f32 -0.5, %v79_v26  ;;  %v90_v25 = vmul.f32 %v970_v2, %v74_v30  ;;  %v205_v34 = vmul.f32 0.75, %v1036_v22  ;;  %v76_v48 = vmul.f32 1.5, %v977_v7 }
  0x38   :  { %v1051_v45 = vsub.f32 %v192_v31, %v208_v21  ;;  %v1053_v46 = vsub.f32 %v125_v32, %v141_v8  ;;  %v154_v52 = vmul.f32 0.6666667, %v970_v2  ;;  %v186_v54 = vmul.f32 1.75, %v970_v2 }
  0x39   :  { %v127_v49 = vmul.f32 %v1047_v41, %v111_v29  ;;  %v1058_v51 = vadd.f32 -0.5, %v90_v25  ;;  %v92_v63 = vmul.f32 %v977_v7, %v76_v48  ;;  %v124_v1 = vmul.f32 1.6666666, %v977_v7 }
  0x3a   :  { %v256_v57 = vmul.f32 %v240_v6, %v1051_v45  ;;  %v189_v62 = vmul.f32 %v173_v9, %v1053_v46  ;;  %v269_v59 = vmul.f32 0.8, %v1053_v46  ;;  %v207_v5 = vmul.f32 0.75, %v1047_v41 }
  0x3b   :  { %v1067_v3 = vsub.f32 %v127_v49, %v143_v35  ;;  %v138_v8 = vmul.f32 %v1058_v51, %v122_v44  ;;  %v1073_v26 = vadd.f32 -0.5, %v92_v63  ;;  %v156_v6 = vmul.f32 0.6666667, %v977_v7 }
  0x3c   :  { %v1071_v10 = vpop.eup %811  ;;  %v288_v14 = vsub.f32 %v256_v57, %v272_v39  ;;  %v221_v21 = vsub.f32 %v189_v62, %v205_v34  ;;  %v239_v29 = vmul.f32 1.8, %v963_v60  ;;  %v218_v35 = vmul.f32 0.75, %v1058_v51 }
  0x3d   :  { %v191_v9 = vmul.f32 %v175_v36, %v1067_v3  ;;  %v1078_v30 = vsub.f32 %v138_v8, %v154_v52  ;;  %v140_v25 = vmul.f32 %v1073_v26, %v124_v1  ;;  %v73_v39 = vmul.f32 1.5, %v984_v12 }
  0x3e   :  { %v1080_v31 = vpop.eup %813  ;;  %445 = vmatprep.subr.mxu1 %v288_v14  ;;  %v253_v32 = vmul.f32 %v237_v24, %v221_v21  ;;  %v271_v34 = vmul.f32 0.8, %v1067_v3  ;;  %v188_v36 = vmul.f32 1.75, %v977_v7  ;;  %v121_v24 = vmul.f32 1.6666666, %v984_v12 }
  0x3f   :  { %v223_v44 = vsub.f32 %v191_v9, %v207_v5  ;;  %v202_v48 = vmul.f32 %v186_v54, %v1078_v30  ;;  %v1088_v52 = vsub.f32 %v140_v25, %v156_v6  ;;  %v89_v57 = vmul.f32 %v984_v12, %v73_v39 }
  0x40   :  { %v285_v49 = vsub.f32 %v253_v32, %v269_v59  ;;  %v250_v63 = vmul.f32 1.8, %v970_v2  ;;  %v153_v5 = vmul.f32 0.6666667, %v984_v12  ;;  %v75_v8 = vmul.f32 1.5, %v992_v17 }
  0x41   :  { %v255_v62 = vmul.f32 %v239_v29, %v223_v44  ;;  %v1093_v1 = vadd.f32 -0.5, %v89_v57  ;;  %v1098_v59 = vsub.f32 %v202_v48, %v218_v35  ;;  %v220_v14 = vmul.f32 0.75, %v1073_v26 }
  0x42   :  { %357 = vmatpush1.msra.mxu0 %v285_v49  ;;  %v185_v6 = vmul.f32 1.75, %v984_v12  ;;  %v204_v9 = vmul.f32 %v188_v36, %v1088_v52  ;;  %v91_v32 = vmul.f32 %v992_v17, %v75_v8  ;;  %v123_v25 = vmul.f32 1.6666666, %v992_v17 }
  0x43   :  { %v287_v54 = vsub.f32 %v255_v62, %v271_v34  ;;  %358 = vmatprep.subr.mxu0 %v986_v13  ;;  %v137_v29 = vmul.f32 %v1093_v1, %v121_v24  ;;  %v1109_v13 = vmul.f32 0.8, %v1078_v30  ;;  %v252_v35 = vmul.f32 1.8, %v977_v7  ;;  %v33_v62 = vld [vmem:[#allocation2 + $0x20] sm:$0xff] }
  0x44   :  { %359 = vmatpush1.msra.mxu0 %v1000_v27  ;;  %v66_v39 = vmul.f32 1.5, %v1071_v10  ;;  %v217_v34 = vmul.f32 0.75, %v1093_v1  ;;  %v1117_v48 = vadd.f32 -0.5, %v91_v32  ;;  %v155_v36 = vmul.f32 0.6666667, %v992_v17 }
  0x45   :  { %446 = vmatpush1.msra.mxu1 %v287_v54  ;;  %360 = vmatprep.subr.mxu0 %v1018_v40  ;;  %v1114_v27 = vsub.f32 %v137_v29, %v153_v5  ;;  %v1123_v40 = vmul.f32 %v250_v63, %v1098_v59  ;;  %v249_v49 = vmul.f32 1.8, %v984_v12  ;;  %v1130_v57 = vsub.f32 %v204_v9, %v220_v14  ;;  %v35_v14 = vld [vmem:[#allocation2 + $0x30] sm:$0xff] }
  0x46   :  { %447 = vmatprep.subr.mxu1 %v994_v20  ;;  %361 = vmatpush1.msra.mxu0 %v221_v21  ;;  %v82_v20 = vmul.f32 %v1071_v10, %v66_v39  ;;  %v114_v21 = vmul.f32 1.6666666, %v1071_v10  ;;  %v251_v63 = vmul.f32 1.8, %v992_v17  ;;  %815 = vtanh.f32 %v33_v62 }
  0x47   :  { %448 = vmatpush1.msra.mxu1 %v1010_v43  ;;  %362 = vmatprep.subr.mxu0 %v957_v56  ;;  %v201_v24 = vmul.f32 %v185_v6, %v1114_v27  ;;  %v139_v43 = vmul.f32 %v1117_v48, %v123_v25  ;;  %v187_v56 = vmul.f32 1.75, %v992_v17  ;;  %v281_v6 = vmul.f32 0.8, %v1114_v27 }
  0x48   :  { %449 = vmatprep.subr.mxu1 %v1051_v45  ;;  %363 = vmatpush1.msra.mxu0 %v973_v4  ;;  %v1137_v5 = vadd.f32 -0.5, %v82_v20  ;;  %v146_v45 = vmul.f32 0.6666667, %v1071_v10  ;;  %v68_v4 = vmul.f32 1.5, %v1080_v31  ;;  %817 = vtanh.f32 %v35_v14 }
  0x49   :  { %450 = vmatpush1.msra.mxu1 %v223_v44  ;;  %364 = vmatprep.subr.mxu0 %v1006_v33  ;;  %v1143_v8 = vsub.f32 %v201_v24, %v217_v34  ;;  %v1145_v54 = vsub.f32 %v139_v43, %v155_v36  ;;  %v219_v44 = vmul.f32 0.75, %v1117_v48  ;;  %v178_v33 = vmul.f32 1.75, %v1071_v10  ;;  %v1216_v43 = vld [vmem:[%s1350_s1 + $0x8] sm:$0xff] }
  0x4a   :  { %451 = vmatprep.subr.mxu1 %v965_v61  ;;  %365 = vmatpush1.msra.mxu0 %v1053_v46  ;;  %v130_v9 = vmul.f32 %v1137_v5, %v114_v21  ;;  %v84_v61 = vmul.f32 %v1080_v31, %v68_v4  ;;  %v116_v46 = vmul.f32 1.6666666, %v1080_v31  ;;  %v210_v25 = vmul.f32 0.75, %v1137_v5 }
  0x4b   :  { %452 = vmatpush1.msra.mxu1 %v989_v15  ;;  %366 = vmatprep.subr.mxu0 %v934_v38  ;;  %v265_v29 = vmul.f32 %v249_v49, %v1143_v8  ;;  %v203_v32 = vmul.f32 %v187_v56, %v1145_v54  ;;  %v148_v15 = vmul.f32 0.6666667, %v1080_v31  ;;  %v244_v24 = vmul.f32 1.8, %v1080_v31 }
  0x4c   :  { %453 = vmatprep.subr.mxu1 %v1033_v16  ;;  %367 = vmatpush1.msra.mxu0 %v945_v47  ;;  %v1162_v38 = vsub.f32 %v130_v9, %v146_v45  ;;  %v1165_v39 = vadd.f32 -0.5, %v84_v61  ;;  %v268_v47 = vmul.f32 %v252_v35, %v1130_v57  ;;  %v284_v16 = vmul.f32 0.8, %v1088_v52  ;;  %v1185_v35 = vld [vmem:[%s1350_s1] sm:$0xff]  ;;  %v1234_v45 = vld [vmem:[%s1350_s1 + $0x10] sm:$0xff] }
  0x4d   :  { %454 = vmatpush1.msra.mxu1 %v1067_v3  ;;  %368 = vmatprep.subr.mxu0 %v982_v11  ;;  %v1171_v34 = vsub.f32 %v203_v32, %v219_v44  ;;  %v242_v3 = vmul.f32 1.8, %v1071_v10  ;;  %v283_v11 = vmul.f32 0.8, %v1145_v54 }
  0x4e   :  { %455 = vmatprep.subr.mxu1 %v939_v42  ;;  %369 = vmatpush1.msra.mxu0 %v1036_v22  ;;  %v194_v36 = vmul.f32 %v178_v33, %v1162_v38  ;;  %v132_v42 = vmul.f32 %v1165_v39, %v116_v46  ;;  %v180_v22 = vmul.f32 1.75, %v1080_v31  ;;  %v212_v21 = vmul.f32 0.75, %v1165_v39  ;;  %v1251_v46 = vld [vmem:[%s1350_s1 + $0x18] sm:$0xff]  ;;  %s868_s1 = smov [#allocation5]  }
  0x4f   :  { %456 = vmatpush1.msra.mxu1 %v960_v58  ;;  %370 = vmatprep.subr.mxu0 %v909_v18  ;;  %v298_v18 = vsub.f32 %v1123_v40, %v1109_v13  ;;  %v297_v58 = vsub.f32 %v265_v29, %v281_v6  ;;  %v267_v49 = vmul.f32 %v251_v63, %v1171_v34  ;;  %s735_s6 = sshll.u32 %s868_s1, 4  ;;  %s736_s6 = int_to_ptr.vmem [resolvable:$true] %s735_s6 }
  0x50   :  { %457 = vmatprep.subr.mxu1 %v1020_v53  ;;  %371 = vmatpush1.msra.mxu0 %v916_v23  ;;  %v1192_v20 = vsub.f32 %v194_v36, %v210_v25  ;;  %v274_v23 = vmul.f32 0.8, %v1162_v38  ;;  %v1195_v53 = vsub.f32 %v132_v42, %v148_v15  ;;  %v300_v13 = vsub.f32 %v268_v47, %v284_v16  ;;  %s839_s7 = scalar_lea.vmem %s736_s6, 4096  ;;  %p844_p6 = scmp.lt.s32.totalorder %s736_s6, %s736_s6 }
  0x51   :  { %458 = vmatpush1.msra.mxu1 %v1047_v41  ;;  %372 = vmatprep.subr.mxu0 %v932_v37  ;;  %v299_v41 = vsub.f32 %v267_v49, %v283_v11  ;;  %p840_p5 = scmp.ne.s32.totalorder %s736_s6, %s839_s7  ;;  %p845_p7 = scmp.lt.s32.totalorder %s839_s7, %s839_s7 }
  0x52   :  { %459 = vmatprep.subr.mxu1 %v911_v19  ;;  %373 = vmatpush1.msra.mxu0 %v955_v55  ;;  %v258_v37 = vmul.f32 %v242_v3, %v1192_v20  ;;  %v196_v40 = vmul.f32 %v180_v22, %v1195_v53 }
  0x53   :  { %460 = vmatpush1.msra.mxu1 %v922_v28  ;;  %763 = vmatmul.mubr.msk.f32.vlgmr.msra.gmra.mxu0 %vm329_vm0, %v1185_v35  ;;  %v276_v28 = vmul.f32 0.8, %v1195_v53  ;;  %p846_p8 = por %p845_p7, %p844_p6 }
  0x54   :  { %461 = vmatprep.subr.mxu1 %v949_v50  ;;  %532 = vmatprep.subr.mxu0 %v298_v18  ;;  %v290_v19 = vsub.f32 %v258_v37, %v274_v23  ;;  %v1208_v55 = vsub.f32 %v196_v40, %v212_v21 }
  0x55   :  { %462 = vmatpush1.msra.mxu1 %v963_v60  ;;  %533 = vmatpush1.msra.mxu0 %v297_v58  ;;  %v1221_v60 = vpop.eup %815  ;;  %p847_p9 = pnand %p846_p8, %p840_p5 }
  0x56   :  { %767 = vmatmul.mubr.msk.f32.vlgmr.msra.gmra.mxu1 %vm329_vm0, %v1185_v35  ;;  %621 = vmatprep.subr.mxu1 %v300_v13  ;;  %v260_v50 = vmul.f32 %v244_v24, %v1208_v55  ;;  %v1225_v62 = vpop.eup %817  ;;  %v65_v63 = vmul.f32 1.5, %v1221_v60  ;;  %v113_v33 = vmul.f32 1.6666666, %v1221_v60  ;;  %v145_v61 = vmul.f32 0.6666667, %v1221_v60 }
  0x57   :  { %622 = vmatpush1.msra.mxu1 %v299_v41  ;;  %534 = vmatprep.subr.mxu0 %v290_v19  ;;  %v67_v4 = vmul.f32 1.5, %v1225_v62  ;;  %v115_v6 = vmul.f32 1.6666666, %v1225_v62  ;;  %v147_v32 = vmul.f32 0.6666667, %v1225_v62  ;;  %v177_v25 = vmul.f32 1.75, %v1221_v60 }
  0x58   :  { %412 = vmatprep.mubr.f32.mxu0 %v866_v0  ;;  %501 = vmatprep.mubr.f32.mxu1 %v866_v0  ;;  %v292_v56 = vsub.f32 %v260_v50, %v276_v28  ;;  %v81_v44 = vmul.f32 %v1221_v60, %v65_v63  ;;  %v179_v16 = vmul.f32 1.75, %v1225_v62  ;;  %v241_v18 = vmul.f32 1.8, %v1221_v60 }
  0x59   :  { %764 = vmatmul.mubr.msk.f32.gmra.mxu0 %vm329_vm0, %v1216_v43  ;;  %v83_v14 = vmul.f32 %v1225_v62, %v67_v4  ;;  %v243_v49 = vmul.f32 1.8, %v1225_v62 }
  0x5a   :  { %768 = vmatmul.mubr.msk.f32.gmra.mxu1 %vm329_vm0, %v1216_v43  ;;  %418 = vmatprep.mubr.f32.mxu0 %v866_v0  ;;  %v751_v9 = vadd.f32 -0.5, %v81_v44 }
  0x5b   :  { %623 = vmatprep.subr.mxu1 %v292_v56  ;;  %507 = vmatprep.mubr.f32.mxu1 %v866_v0  ;;  %v753_v29 = vadd.f32 -0.5, %v83_v14 }
  0x5c   :  { %v129_v15 = vmul.f32 %v751_v9, %v113_v33  ;;  %v209_v11 = vmul.f32 0.75, %v751_v9 }
  0x5d   :  { %765 = vmatmul.mubr.msk.f32.gmra.mxu0 %vm329_vm0, %v1234_v45  ;;  %v131_v47 = vmul.f32 %v753_v29, %v115_v6  ;;  %v211_v42 = vmul.f32 0.75, %v753_v29 }
  0x5e   :  { %769 = vmatmul.mubr.msk.f32.gmra.mxu1 %vm329_vm0, %v1234_v45  ;;  %424 = vmatprep.mubr.f32.mxu0 %v866_v0  ;;  %v161_v3 = vsub.f32 %v129_v15, %v145_v61 }
  0x5f   :  { %513 = vmatprep.mubr.f32.mxu1 %v866_v0  ;;  %v163_v36 = vsub.f32 %v131_v47, %v147_v32 }
  0x60   :  { %v193_v22 = vmul.f32 %v177_v25, %v161_v3  ;;  %v273_v21 = vmul.f32 0.8, %v161_v3 }
  0x61   :  { %766 = vmatmul.mubr.msk.f32.gmra.mxu0 %vm329_vm0, %v1251_v46  ;;  %v195_v58 = vmul.f32 %v179_v16, %v163_v36  ;;  %v275_v41 = vmul.f32 0.8, %v163_v36 }
  0x62   :  { %770 = vmatmul.mubr.msk.f32.gmra.mxu1 %vm329_vm0, %v1251_v46  ;;  %584 = vmatprep.mubr.f32.mxu0 %v866_v0  ;;  %v225_v23 = vsub.f32 %v193_v22, %v209_v11 }
  0x63   :  { %673 = vmatprep.mubr.f32.mxu1 %v866_v0  ;;  %v227_v13 = vsub.f32 %v195_v58, %v211_v42 }
  0x64   :  { %v257_v37 = vmul.f32 %v241_v18, %v225_v23 }
  0x65   :  { %v259_v40 = vmul.f32 %v243_v49, %v227_v13 }
  0x66   :  { %v289_v24 = vsub.f32 %v257_v37, %v273_v21 }
  0x67   :  { %v291_v19 = vsub.f32 %v259_v40, %v275_v41 }
  0x68   :  { %535 = vmatpush1.msra.mxu0 %v289_v24 }
  0x69   :  { %624 = vmatpush1.msra.mxu1 %v291_v19  ;;  %536 = vmatprep.subr.mxu0 %v1098_v59 }
  0x6a   :  { %625 = vmatprep.subr.mxu1 %v1130_v57  ;;  %537 = vmatpush1.msra.mxu0 %v1143_v8 }
  0x6b   :  { %626 = vmatpush1.msra.mxu1 %v1171_v34  ;;  %538 = vmatprep.subr.mxu0 %v1192_v20 }
  0x6c   :  { %627 = vmatprep.subr.mxu1 %v1208_v55  ;;  %539 = vmatpush1.msra.mxu0 %v225_v23 }
  0x6d   :  { %628 = vmatpush1.msra.mxu1 %v227_v13  ;;  %540 = vmatprep.subr.mxu0 %v1078_v30 }
  0x6e   :  { %629 = vmatprep.subr.mxu1 %v1088_v52  ;;  %541 = vmatpush1.msra.mxu0 %v1114_v27 }
  0x6f   :  { %630 = vmatpush1.msra.mxu1 %v1145_v54  ;;  %542 = vmatprep.subr.mxu0 %v1162_v38 }
  0x70   :  { %631 = vmatprep.subr.mxu1 %v1195_v53  ;;  %543 = vmatpush1.msra.mxu0 %v161_v3 }
  0x71   :  { %632 = vmatpush1.msra.mxu1 %v163_v36  ;;  %544 = vmatprep.subr.mxu0 %v1058_v51 }
  0x72   :  { %633 = vmatprep.subr.mxu1 %v1073_v26  ;;  %545 = vmatpush1.msra.mxu0 %v1093_v1 }
  0x73   :  { %634 = vmatpush1.msra.mxu1 %v1117_v48  ;;  %546 = vmatprep.subr.mxu0 %v1137_v5 }
  0x74   :  { %635 = vmatprep.subr.mxu1 %v1165_v39  ;;  %547 = vmatpush1.msra.mxu0 %v751_v9 }
  0x75   :  { %636 = vmatpush1.msra.mxu1 %v753_v29  ;;  %548 = vmatprep.subr.mxu0 %v970_v2 }
  0x76   :  { %637 = vmatprep.subr.mxu1 %v977_v7  ;;  %549 = vmatpush1.msra.mxu0 %v984_v12 }
  0x77   :  { %638 = vmatpush1.msra.mxu1 %v992_v17  ;;  %550 = vmatprep.subr.mxu0 %v1071_v10 }
  0x78   :  { %639 = vmatprep.subr.mxu1 %v1080_v31  ;;  %551 = vmatpush1.msra.mxu0 %v1221_v60 }
  0x79   :  { %640 = vmatpush1.msra.mxu1 %v1225_v62  ;;  %771 = vmatmul.mubr.msk.f32.vlgmr.msra.gmra.mxu0 %vm329_vm0, %v1185_v35 }
  0x7a   :  { %775 = vmatmul.mubr.msk.f32.vlgmr.msra.gmra.mxu1 %vm329_vm0, %v1185_v35  ;;  %590 = vmatprep.mubr.f32.mxu0 %v866_v0 }
  0x7b   :  { %679 = vmatprep.mubr.f32.mxu1 %v866_v0 }
  0x7d   :  { %772 = vmatmul.mubr.msk.f32.gmra.mxu0 %vm329_vm0, %v1216_v43 }
  0x7e   :  { %776 = vmatmul.mubr.msk.f32.gmra.mxu1 %vm329_vm0, %v1216_v43  ;;  %596 = vmatprep.mubr.f32.mxu0 %v866_v0 }
  0x7f   :  { %685 = vmatprep.mubr.f32.mxu1 %v866_v0 }
  0x81   :  { %773 = vmatmul.mubr.msk.f32.gmra.mxu0 %vm329_vm0, %v1234_v45 }
  0x82   :  { %777 = vmatmul.mubr.msk.f32.gmra.mxu1 %vm329_vm0, %v1234_v45  ;;  %602 = vmatprep.mubr.f32.mxu0 %v866_v0 }
  0x83   :  { %691 = vmatprep.mubr.f32.mxu1 %v866_v0 }
  0x85   :  { %774 = vmatmul.mubr.msk.f32.gmra.mxu0 %vm329_vm0, %v1251_v46 }
  0x86   :  { %778 = vmatmul.mubr.msk.f32.gmra.mxu1 %vm329_vm0, %v1251_v46 }
  0x8c   :  { %v312_v2 = vpop.permute.xlu0 %311  ;;  %v1315_v1 = vpop.permute.xlu1 %321 }
  0x90   :  { %v1313_v30 = vpop.permute.xlu0 %316  ;;  %v1323_v53 = vpop.permute.xlu1 %326 }
 0x113   :  { %v408_v7 = vpop.f32.mrf.mxu0 }
 0x114   :  { %v409_v12 = vadd.f32 %v408_v7, %v312_v2 }
 0x115   :  { %v410_v17 = vpop.f32.mrf.mxu0 }
 0x116   :  { %v497_v51 = vpop.f32.mrf.mxu1  ;;  %698 = vst [vmem:[#allocation5] sm:$0xff] %v409_v12  ;;  %v411_v10 = vadd.f32 %v410_v17, %v312_v2 }
 0x117   :  { %v498_v26 = vadd.f32 %v497_v51, %v312_v2 }
 0x118   :  { %699 = vst [vmem:[#allocation5 + $0x8] sm:$0xff] %v411_v10  ;;  %v499_v31 = vpop.f32.mrf.mxu1 }
 0x119   :  { %700 = vst [vmem:[#allocation5 + $0x10] sm:$0xff] %v498_v26  ;;  %v500_v0 = vadd.f32 %v499_v31, %v312_v2  ;;  %v414_v52 = vpop.f32.mrf.mxu0 }
 0x11a   :  { %v503_v59 = vpop.f32.mrf.mxu1  ;;  %v415_v27 = vadd.f32 %v414_v52, %v1313_v30 }
 0x11b   :  { %701 = vst [vmem:[#allocation5 + $0x18] sm:$0xff] %v500_v0  ;;  %v504_v48 = vadd.f32 %v503_v59, %v1313_v30  ;;  %v416_v57 = vpop.f32.mrf.mxu0 }
 0x11c   :  { %706 = vst [vmem:[#allocation5 + $0x40] sm:$0xff] %v415_v27  ;;  %v417_v5 = vadd.f32 %v416_v57, %v1313_v30  ;;  %v505_v8 = vpop.f32.mrf.mxu1 }
 0x11d   :  { %708 = vst [vmem:[#allocation5 + $0x50] sm:$0xff] %v504_v48  ;;  %v506_v54 = vadd.f32 %v505_v8, %v1313_v30  ;;  %v420_v38 = vpop.f32.mrf.mxu0 }
 0x11e   :  { %707 = vst [vmem:[#allocation5 + $0x48] sm:$0xff] %v417_v5  ;;  %v509_v39 = vpop.f32.mrf.mxu1  ;;  %v421_v34 = vadd.f32 %v420_v38, %v1315_v1 }
 0x11f   :  { %709 = vst [vmem:[#allocation5 + $0x58] sm:$0xff] %v506_v54  ;;  %v510_v35 = vadd.f32 %v509_v39, %v1315_v1  ;;  %v422_v20 = vpop.f32.mrf.mxu0 }
 0x120   :  { %714 = vst [vmem:[#allocation5 + $0x80] sm:$0xff] %v421_v34  ;;  %v423_v55 = vadd.f32 %v422_v20, %v1315_v1  ;;  %v511_v28 = vpop.f32.mrf.mxu1 }
 0x121   :  { %716 = vst [vmem:[#allocation5 + $0x90] sm:$0xff] %v510_v35  ;;  %v512_v43 = vadd.f32 %v511_v28, %v1315_v1  ;;  %v426_v50 = vpop.f32.mrf.mxu0 }
 0x122   :  { %715 = vst [vmem:[#allocation5 + $0x88] sm:$0xff] %v423_v55  ;;  %v515_v60 = vpop.f32.mrf.mxu1  ;;  %v427_v56 = vadd.f32 %v426_v50, %v1323_v53 }
 0x123   :  { %717 = vst [vmem:[#allocation5 + $0x98] sm:$0xff] %v512_v43  ;;  %v516_v62 = vadd.f32 %v515_v60, %v1323_v53  ;;  %v428_v63 = vpop.f32.mrf.mxu0 }
 0x124   :  { %722 = vst [vmem:[#allocation5 + $0xc0] sm:$0xff] %v427_v56  ;;  %v429_v45 = vadd.f32 %v428_v63, %v1323_v53  ;;  %v517_v4 = vpop.f32.mrf.mxu1 }
 0x125   :  { %724 = vst [vmem:[#allocation5 + $0xd0] sm:$0xff] %v516_v62  ;;  %v518_v44 = vadd.f32 %v517_v4, %v1323_v53 }
 0x126   :  { %723 = vst [vmem:[#allocation5 + $0xc8] sm:$0xff] %v429_v45 }
 0x127   :  { %725 = vst [vmem:[#allocation5 + $0xd8] sm:$0xff] %v518_v44 }
 0x139   :  { %v586_v33 = vpop.f32.mrf.mxu0 }
 0x13a   :  { %v587_v14 = vadd.f32 %v586_v33, %v312_v2  ;;  %v675_v6 = vpop.f32.mrf.mxu1 }
 0x13b   :  { %v676_v9 = vadd.f32 %v675_v6, %v312_v2  ;;  %v588_v61 = vpop.f32.mrf.mxu0 }
 0x13c   :  { %702 = vst [vmem:[#allocation5 + $0x20] sm:$0xff] %v587_v14  ;;  %v589_v46 = vadd.f32 %v588_v61, %v312_v2  ;;  %v677_v29 = vpop.f32.mrf.mxu1 }
 0x13d   :  { %704 = vst [vmem:[#allocation5 + $0x30] sm:$0xff] %v676_v9  ;;  %v678_v32 = vadd.f32 %v677_v29, %v312_v2  ;;  %v592_v15 = vpop.f32.mrf.mxu0 }
 0x13e   :  { %703 = vst [vmem:[#allocation5 + $0x28] sm:$0xff] %v589_v46  ;;  %v593_v25 = vadd.f32 %v592_v15, %v1313_v30  ;;  %v681_v47 = vpop.f32.mrf.mxu1 }
 0x13f   :  { %705 = vst [vmem:[#allocation5 + $0x38] sm:$0xff] %v678_v32  ;;  %v682_v16 = vadd.f32 %v681_v47, %v1313_v30  ;;  %v594_v3 = vpop.f32.mrf.mxu0 }
 0x140   :  { %710 = vst [vmem:[#allocation5 + $0x60] sm:$0xff] %v593_v25  ;;  %v595_v11 = vadd.f32 %v594_v3, %v1313_v30  ;;  %v683_v36 = vpop.f32.mrf.mxu1 }
 0x141   :  { %712 = vst [vmem:[#allocation5 + $0x70] sm:$0xff] %v682_v16  ;;  %v684_v42 = vadd.f32 %v683_v36, %v1313_v30  ;;  %v598_v22 = vpop.f32.mrf.mxu0 }
 0x142   :  { %711 = vst [vmem:[#allocation5 + $0x68] sm:$0xff] %v595_v11  ;;  %v599_v18 = vadd.f32 %v598_v22, %v1315_v1  ;;  %v687_v58 = vpop.f32.mrf.mxu1 }
 0x143   :  { %713 = vst [vmem:[#allocation5 + $0x78] sm:$0xff] %v684_v42  ;;  %v688_v49 = vadd.f32 %v687_v58, %v1315_v1  ;;  %v600_v23 = vpop.f32.mrf.mxu0 }
 0x144   :  { %718 = vst [vmem:[#allocation5 + $0xa0] sm:$0xff] %v599_v18  ;;  %v601_v21 = vadd.f32 %v600_v23, %v1315_v1  ;;  %v689_v13 = vpop.f32.mrf.mxu1 }
 0x145   :  { %720 = vst [vmem:[#allocation5 + $0xb0] sm:$0xff] %v688_v49  ;;  %v690_v41 = vadd.f32 %v689_v13, %v1315_v1  ;;  %v604_v37 = vpop.f32.mrf.mxu0 }
 0x146   :  { %719 = vst [vmem:[#allocation5 + $0xa8] sm:$0xff] %v601_v21  ;;  %v605_v40 = vadd.f32 %v604_v37, %v1323_v53  ;;  %v693_v24 = vpop.f32.mrf.mxu1 }
 0x147   :  { %721 = vst [vmem:[#allocation5 + $0xb8] sm:$0xff] %v690_v41  ;;  %v694_v19 = vadd.f32 %v693_v24, %v1323_v53  ;;  %v606_v2 = vpop.f32.mrf.mxu0 }
 0x148   :  { %726 = vst [vmem:[#allocation5 + $0xe0] sm:$0xff] %v605_v40  ;;  %v607_v7 = vadd.f32 %v606_v2, %v1323_v53  ;;  %v695_v12 = vpop.f32.mrf.mxu1 }
 0x149   :  { %728 = vst [vmem:[#allocation5 + $0xf0] sm:$0xff] %v694_v19  ;;  %v696_v17 = vadd.f32 %v695_v12, %v1323_v53 }
 0x14a   :  { %727 = vst [vmem:[#allocation5 + $0xe8] sm:$0xff] %v607_v7 }
 0x14b   :  { %729 = vst [vmem:[#allocation5 + $0xf8] sm:$0xff] %v696_v17 }
 0x14c   :  { %850 = shalt.err (!%p847_p9)
}
 0x14d   :  { %741 = dma.vmem_to_hbm [thread:$0]  %s736_s6, 4096, %s1352_s3, [#allocation4], %s864_s15, %s864_s15, %s865_s16  }
 0x14e   :  { %861 = dma.done.wait [#allocation4], 4096  }
 0x14f   :  { %862 = vsyncadd [#allocation4], 4294963200 }
 0x150   :  { %745 = vsyncpa [#allocation3], 1 }
 0x151   :  { %746 = vsyncpa [#allocation4], 1 }

</bundles_post_ra>
